<compile_context>
chip_gen: v6e
topology: v6e:2x2x1
jax: 0.10.0
libtpu: 0.0.40
codegen_flags: <defaults>
</compile_context>

<pallas_src>
import math

import jax
import jax.numpy as jnp
from jax.experimental import pallas as pl
from jax.experimental.pallas import tpu as pltpu


def _round_up(x: int, m: int) -> int:
    return ((x + m - 1) // m) * m


def _cdiv(a: int, b: int) -> int:
    return -(-a // b)


def _num_tensorcores() -> int:
    """2 TensorCores per chip on v7x; 1 on v5e/v6e. Only used to decide whether
    splitting a medium batch across grid steps is worthwhile."""
    try:
        kind = jax.devices()[0].device_kind.lower()
        if "v7" in kind:
            return 2
    except Exception:
        pass
    return 1


def make_concat_mlp_kernel(n_x: int, n_layers: int, hpad: int, out_cols: int):
    """Kernel ref order:
         x_0 .. x_{n_x-1}        (TB, d_i)          bf16 activations
         w0_0 .. w0_{n_x-1}      (d_i, hpad)        bf16 (W0 split at concat bounds; n_x==1 -> unsplit)
         w_1 .. w_{n_layers-1}   (hpad, hpad)       bf16
         w_out                   (hpad, out_cols)   bf16
         b_packed                (n_layers+1, bpad) f32
         out                     (TB, out_cols)     f32 (narrow writeback)
    """

    def kernel(*refs):
        x_refs = refs[:n_x]
        w0_refs = refs[n_x:2 * n_x]
        w_hidden = refs[2 * n_x:2 * n_x + n_layers - 1]
        w_out_ref = refs[2 * n_x + n_layers - 1]
        b_ref = refs[2 * n_x + n_layers]
        out_ref = refs[-1]

        b_all = b_ref[...]  # (n_layers+1, bpad) f32, loaded once

        # ---- layer 0: fused concat (cat(x) @ W0 == sum_i x_i @ W0_i), f32 acc
        acc = jnp.dot(x_refs[0][...], w0_refs[0][...],
                      preferred_element_type=jnp.float32)
        for i in range(1, n_x):
            acc = acc + jnp.dot(x_refs[i][...], w0_refs[i][...],
                                preferred_element_type=jnp.float32)
        h = jnp.tanh(acc + b_all[0, :hpad][None, :])      # f32 elementwise (v5e-safe)

        # ---- remaining hidden layers (lane-dense hpad width)
        for layer in range(1, n_layers):
            w = w_hidden[layer - 1][...]
            acc = jnp.dot(h.astype(w.dtype), w, preferred_element_type=jnp.float32)
            h = jnp.tanh(acc + b_all[layer, :hpad][None, :])

        # ---- output (identity) layer, narrow store
        w_out = w_out_ref[...]
        y = jnp.dot(h.astype(w_out.dtype), w_out, preferred_element_type=jnp.float32)
        out_ref[...] = (y + b_all[n_layers, :out_cols][None, :]).astype(out_ref.dtype)

    return kernel


def prepare_concat_mlp_weights(params, in_dims, *, matmul_dtype=jnp.bfloat16,
                               fuse_concat=None):
    """One-time cast/pad/pack of the (W, b) params into kernel operands.
    Call once and reuse across forward() calls (hoists per-call weight casts)."""
    n_layers = len(params) - 1
    assert n_layers >= 1
    size = int(params[0][0].shape[1])
    ac_dim = int(params[-1][0].shape[1])
    in_dims = tuple(int(d) for d in in_dims)
    sum_d = sum(in_dims)
    assert int(params[0][0].shape[0]) == sum_d

    if fuse_concat is None:
        # A host-side concat of narrow inputs is ~free (one tiny XLA op); only fuse
        # the concat into layer 0 (split W0, extra DMA streams + MXU passes) when
        # the concatenated activation would be a large HBM round trip.
        fuse_concat = sum_d > 512

    hpad = _round_up(size, 128)                 # lane-dense hidden width
    out_cols = _round_up(ac_dim, 8)             # narrow output -> small HBM writeback
    bpad = max(hpad, _round_up(out_cols, 128))  # packed-bias lane width

    w0 = jnp.asarray(params[0][0], jnp.float32)
    w0 = jnp.pad(w0, ((0, 0), (0, hpad - size)))
    if fuse_concat:
        w0_chunks, off = [], 0
        for d in in_dims:
            w0_chunks.append(w0[off:off + d].astype(matmul_dtype))
            off += d
    else:
        w0_chunks = [w0.astype(matmul_dtype)]

    w_hidden = []
    for l in range(1, n_layers):
        w = jnp.asarray(params[l][0], jnp.float32)
        w_hidden.append(jnp.pad(w, ((0, hpad - size), (0, hpad - size)))
                        .astype(matmul_dtype))

    w_out = jnp.asarray(params[-1][0], jnp.float32)
    w_out = jnp.pad(w_out, ((0, hpad - size), (0, out_cols - ac_dim))).astype(matmul_dtype)

    b_packed = jnp.zeros((n_layers + 1, bpad), jnp.float32)
    for l in range(n_layers):
        b_packed = b_packed.at[l, :size].set(jnp.asarray(params[l][1], jnp.float32))
    b_packed = b_packed.at[n_layers, :ac_dim].set(jnp.asarray(params[-1][1], jnp.float32))

    return dict(
        n_layers=n_layers, size=size, ac_dim=ac_dim, in_dims=in_dims,
        hpad=hpad, out_cols=out_cols, fuse_concat=fuse_concat,
        matmul_dtype=matmul_dtype,
        w0_chunks=tuple(w0_chunks), w_hidden=tuple(w_hidden),
        w_out=w_out, b_packed=b_packed,
    )


def concat_mlp_forward(inputs, prepared, logstd, *, dim=1, batch_tile=512):
    """ConcatMLP.forward. Returns (batch_mean, batch_scale_tril) of the
    MultivariateNormal the torch module builds.

    inputs:   list of (batch, d_i) arrays, concatenated along dim=1.
    prepared: output of prepare_concat_mlp_weights(params, in_dims).
    """
    assert dim == 1, "ConcatMLP kernel implements concatenation along dim=1"
    in_dims = prepared["in_dims"]
    n_layers = prepared["n_layers"]
    size = prepared["size"]
    ac_dim = prepared["ac_dim"]
    hpad = prepared["hpad"]
    out_cols = prepared["out_cols"]
    dt = prepared["matmul_dtype"]

    assert len(inputs) == len(in_dims)
    assert all(int(x.shape[1]) == d for x, d in zip(inputs, in_dims))
    batch = int(inputs[0].shape[0])
    sum_d = sum(in_dims)

    # ---- batch tiling --------------------------------------------------------
    ncores = _num_tensorcores()
    if batch <= 32:
        tb = _round_up(batch, 16)                      # bf16 sublane pack
    elif batch <= ncores * batch_tile:
        # Split across TensorCores only when there is more than one (v7x);
        # on v5e/v6e the grid is a serial loop, so keep a single big tile.
        align = 128 if batch >= 256 * ncores else 16
        tb = min(_round_up(_cdiv(batch, ncores), align), batch_tile)
    else:
        n_tiles = _cdiv(batch, batch_tile)
        if ncores > 1 and n_tiles % ncores:
            n_tiles = _round_up(n_tiles, ncores)       # balance tiles over cores
        tb = _round_up(_cdiv(batch, n_tiles), 128)
    padded_batch = _round_up(batch, tb)
    grid = (padded_batch // tb,)

    # ---- activations: cast directly to bf16; pad batch only if needed --------
    if prepared["fuse_concat"]:
        x_ops = [jnp.asarray(x).astype(dt) for x in inputs]
    else:
        x_ops = [jnp.concatenate([jnp.asarray(x).astype(dt) for x in inputs], axis=1)]
    if padded_batch != batch:
        x_ops = [jnp.pad(x, ((0, padded_batch - batch), (0, 0))) for x in x_ops]

    w0_chunks = prepared["w0_chunks"]
    w_hidden = prepared["w_hidden"]
    w_out = prepared["w_out"]
    b_packed = prepared["b_packed"]
    n_x = len(x_ops)

    kernel = make_concat_mlp_kernel(n_x, n_layers, hpad, out_cols)

    def _resident(arr):
        # Weights/biases stay VMEM-resident across batch tiles (constant index map).
        # TODO(synk): for very wide MLPs (size >= 1024) add pipeline_mode=pl.Buffered(1)
        # here so resident weights are not double-buffered (v7x VMEM is 64 MiB).
        return pl.BlockSpec(arr.shape, lambda i: (0, 0))

    x_specs = [pl.BlockSpec((tb, int(x.shape[1])), lambda i: (i, 0)) for x in x_ops]
    w_specs = ([_resident(w) for w in w0_chunks]
               + [_resident(w) for w in w_hidden]
               + [_resident(w_out), _resident(b_packed)])

    weight_bytes = sum(int(w.size) * w.dtype.itemsize
                       for w in (*w0_chunks, *w_hidden, w_out, b_packed))
    act_bytes = sum(int(x.size) * x.dtype.itemsize for x in x_ops)
    out_bytes = padded_batch * out_cols * 4
    cost = pl.CostEstimate(
        flops=2 * batch * (sum_d * size + (n_layers - 1) * size * size + size * ac_dim),
        transcendentals=batch * size * n_layers,
        bytes_accessed=weight_bytes + act_bytes + out_bytes,
    )

    out = pl.pallas_call(
        kernel,
        out_shape=jax.ShapeDtypeStruct((padded_batch, out_cols), jnp.float32),
        grid=grid,
        in_specs=x_specs + w_specs,
        out_specs=pl.BlockSpec((tb, out_cols), lambda i: (i, 0)),
        compiler_params=pltpu.CompilerParams(
            dimension_semantics=("parallel",),
            vmem_limit_bytes=min(64 << 20, max(32 << 20, 4 * weight_bytes)),
        ),
        cost_estimate=cost,
    )(*x_ops, *w0_chunks, *w_hidden, w_out, b_packed)

    batch_mean = out[:batch, :ac_dim]

    # scale_tril = diag(exp(logstd)) repeated over the batch (parameter-only glue).
    scale_tril = jnp.diag(jnp.exp(jnp.asarray(logstd, jnp.float32)))
    batch_scale_tril = jnp.broadcast_to(scale_tril, (batch, ac_dim, ac_dim))
    return batch_mean, batch_scale_tril


def init_mlp_params(key, ob_dim, ac_dim, n_layers, size):
    """Deterministic PyTorch-Linear-style init: U(-1/sqrt(fan_in), 1/sqrt(fan_in))."""
    dims = [ob_dim] + [size] * n_layers + [ac_dim]
    params = []
    for i in range(len(dims) - 1):
        fan_in, fan_out = dims[i], dims[i + 1]
        key, wk, bk = jax.random.split(key, 3)
        bound = 1.0 / math.sqrt(fan_in)
        w = jax.random.uniform(wk, (fan_in, fan_out), jnp.float32, -bound, bound)
        b = jax.random.uniform(bk, (fan_out,), jnp.float32, -bound, bound)
        params.append((w, b))
    return params


def reference_forward(inputs, params, logstd, dim=1):
    """Plain-JAX f32 reference mirroring the PyTorch module."""
    x = jnp.concatenate([jnp.asarray(i, jnp.float32) for i in inputs], axis=dim)
    h = x
    for w, b in params[:-1]:
        h = jnp.tanh(h @ w + b)
    mean = h @ params[-1][0] + params[-1][1]
    scale_tril = jnp.diag(jnp.exp(jnp.asarray(logstd, jnp.float32)))
    return mean, jnp.broadcast_to(scale_tril, (mean.shape[0],) + scale_tril.shape)


if __name__ == "__main__":
    # Small shapes consistent with the MLP policy (kernel scales to large batch via grid).
    ac_dim = 4
    n_layers = 2
    size = 32
    d1, d2 = 12, 4          # two inputs concatenated along dim=1 (obs + goal features)
    ob_dim = d1 + d2

    key = jax.random.PRNGKey(0)
    key, k1, k2 = jax.random.split(key, 3)
    params = init_mlp_params(key, ob_dim, ac_dim, n_layers, size)
    logstd = jnp.zeros((ac_dim,), jnp.float32)   # nn.Parameter(torch.zeros(ac_dim))

    # ---- test 1: small batch, host-side-concat path (weights prepared once) ----
    batch = 8
    inp_a = jax.random.normal(k1, (batch, d1), jnp.float32)
    inp_b = jax.random.normal(k2, (batch, d2), jnp.float32)
    prepared = prepare_concat_mlp_weights(params, (d1, d2))   # fuse_concat auto -> False
    batch_mean, batch_scale_tril = concat_mlp_forward([inp_a, inp_b], prepared, logstd)
    jax.block_until_ready(batch_mean)
    jax.block_until_ready(batch_scale_tril)
    assert batch_mean.shape == (batch, ac_dim)
    assert batch_scale_tril.shape == (batch, ac_dim, ac_dim)
    ref_mean, ref_tril = reference_forward([inp_a, inp_b], params, logstd)
    max_err = float(jnp.max(jnp.abs(batch_mean - ref_mean)))
    assert max_err < 5e-2, f"small-batch mean mismatch, max abs err = {max_err}"
    assert bool(jnp.all(batch_scale_tril == ref_tril))

    # ---- test 2: large, non-divisible batch; exercises multi-tile grid, batch
    #      padding and the split-W0 fused-concat kernel path ----
    batch2 = 1100
    key, k3, k4 = jax.random.split(key, 3)
    big_a = jax.random.normal(k3, (batch2, d1), jnp.float32)
    big_b = jax.random.normal(k4, (batch2, d2), jnp.float32)
    prepared_split = prepare_concat_mlp_weights(params, (d1, d2), fuse_concat=True)
    mean2, tril2 = concat_mlp_forward([big_a, big_b], prepared_split, logstd)
    jax.block_until_ready(mean2)
    assert mean2.shape == (batch2, ac_dim)
    ref_mean2, _ = reference_forward([big_a, big_b], params, logstd)
    max_err2 = float(jnp.max(jnp.abs(mean2 - ref_mean2)))
    assert max_err2 < 5e-2, f"large-batch mean mismatch, max abs err = {max_err2}"

    print("KERNEL_OK")
</pallas_src>

<mosaic_0001>
module attributes {stable_mosaic.version = 11 : i64} {
  func.func @kernel(%arg0: i32, %arg1: memref<16x16xbf16, #tpu.memory_space<vmem>>, %arg2: memref<16x128xbf16, #tpu.memory_space<vmem>>, %arg3: memref<128x128xbf16, #tpu.memory_space<vmem>>, %arg4: memref<128x8xbf16, #tpu.memory_space<vmem>>, %arg5: memref<3x128xf32, #tpu.memory_space<vmem>>, %arg6: memref<16x8xf32, #tpu.memory_space<vmem>>) attributes {dimension_semantics = [#tpu.dimension_semantics<parallel>], iteration_bounds = array<i64: 1>, scalar_prefetch = 0 : i64, scratch_operands = 0 : i64, tpu.core_type = #tpu.core_type<tc>, window_params = [{transform_indices = @transform_0, window_bounds = array<i64: 16, 16>}, {pipeline_mode = #tpu.pipeline_mode<synchronous>, transform_indices = @transform_1, window_bounds = array<i64: 16, 128>}, {pipeline_mode = #tpu.pipeline_mode<synchronous>, transform_indices = @transform_2, window_bounds = array<i64: 128, 128>}, {pipeline_mode = #tpu.pipeline_mode<synchronous>, transform_indices = @transform_3, window_bounds = array<i64: 128, 8>}, {pipeline_mode = #tpu.pipeline_mode<synchronous>, transform_indices = @transform_4, window_bounds = array<i64: 3, 128>}, {transform_indices = @transform_5, window_bounds = array<i64: 16, 8>}]} {
    %c0 = arith.constant 0 : index
    %c0_0 = arith.constant 0 : index
    %0 = vector.load %arg5[%c0, %c0_0] : memref<3x128xf32, #tpu.memory_space<vmem>>, vector<3x128xf32>
    %c0_1 = arith.constant 0 : index
    %c0_2 = arith.constant 0 : index
    %1 = vector.load %arg1[%c0_1, %c0_2] : memref<16x16xbf16, #tpu.memory_space<vmem>>, vector<16x16xbf16>
    %c0_3 = arith.constant 0 : index
    %c0_4 = arith.constant 0 : index
    %2 = vector.load %arg2[%c0_3, %c0_4] : memref<16x128xbf16, #tpu.memory_space<vmem>>, vector<16x128xbf16>
    %cst = arith.constant dense<0.000000e+00> : vector<16x128xf32>
    %3 = tpu.matmul %1, %2, %cst {dimension_numbers = #tpu.dot_dimension_numbers<[1], [0], [0], [1], [0, 0, 1, 1], [], []>} : vector<16x16xbf16>, vector<16x128xbf16>, vector<16x128xf32> -> vector<16x128xf32>
    %4 = vector.extract_strided_slice %0 {offsets = [0, 0], sizes = [1, 128], strides = [1, 1]} : vector<3x128xf32> to vector<1x128xf32>
    %5 = vector.shape_cast %4 : vector<1x128xf32> to vector<128xf32>
    %6 = vector.shape_cast %5 : vector<128xf32> to vector<1x128xf32>
    %7 = vector.broadcast %6 : vector<1x128xf32> to vector<16x128xf32>
    %8 = arith.addf %3, %7 : vector<16x128xf32>
    %9 = math.tanh %8 : vector<16x128xf32>
    %c0_5 = arith.constant 0 : index
    %c0_6 = arith.constant 0 : index
    %10 = vector.load %arg3[%c0_5, %c0_6] : memref<128x128xbf16, #tpu.memory_space<vmem>>, vector<128x128xbf16>
    %11 = arith.truncf %9 : vector<16x128xf32> to vector<16x128xbf16>
    %cst_7 = arith.constant dense<0.000000e+00> : vector<16x128xf32>
    %12 = tpu.matmul %11, %10, %cst_7 {dimension_numbers = #tpu.dot_dimension_numbers<[1], [0], [0], [1], [0, 0, 1, 1], [], []>} : vector<16x128xbf16>, vector<128x128xbf16>, vector<16x128xf32> -> vector<16x128xf32>
    %13 = vector.extract_strided_slice %0 {offsets = [1, 0], sizes = [1, 128], strides = [1, 1]} : vector<3x128xf32> to vector<1x128xf32>
    %14 = vector.shape_cast %13 : vector<1x128xf32> to vector<128xf32>
    %15 = vector.shape_cast %14 : vector<128xf32> to vector<1x128xf32>
    %16 = vector.broadcast %15 : vector<1x128xf32> to vector<16x128xf32>
    %17 = arith.addf %12, %16 : vector<16x128xf32>
    %18 = math.tanh %17 : vector<16x128xf32>
    %c0_8 = arith.constant 0 : index
    %c0_9 = arith.constant 0 : index
    %19 = vector.load %arg4[%c0_8, %c0_9] : memref<128x8xbf16, #tpu.memory_space<vmem>>, vector<128x8xbf16>
    %20 = arith.truncf %18 : vector<16x128xf32> to vector<16x128xbf16>
    %cst_10 = arith.constant dense<0.000000e+00> : vector<16x8xf32>
    %21 = tpu.matmul %20, %19, %cst_10 {dimension_numbers = #tpu.dot_dimension_numbers<[1], [0], [0], [1], [0, 0, 1, 1], [], []>} : vector<16x128xbf16>, vector<128x8xbf16>, vector<16x8xf32> -> vector<16x8xf32>
    %22 = vector.extract_strided_slice %0 {offsets = [2, 0], sizes = [1, 8], strides = [1, 1]} : vector<3x128xf32> to vector<1x8xf32>
    %23 = vector.shape_cast %22 : vector<1x8xf32> to vector<8xf32>
    %24 = vector.shape_cast %23 : vector<8xf32> to vector<1x8xf32>
    %25 = vector.broadcast %24 : vector<1x8xf32> to vector<16x8xf32>
    %26 = arith.addf %21, %25 : vector<16x8xf32>
    %c0_11 = arith.constant 0 : index
    %c0_12 = arith.constant 0 : index
    %27 = vector.load %arg6[%c0_11, %c0_12] : memref<16x8xf32, #tpu.memory_space<vmem>>, vector<16x8xf32>
    tpu.vector_store %arg6[%c0_11, %c0_12], %26 {strides = array<i32>} : memref<16x8xf32, #tpu.memory_space<vmem>>, vector<16x8xf32>,
    return
  }
  func.func @transform_0(%arg0: i32) -> (i32, i32) {
    %c0_i32 = arith.constant 0 : i32
    %c0_i32_0 = arith.constant 0 : i32
    return %arg0, %c0_i32 : i32, i32
  }
  func.func @transform_1(%arg0: i32) -> (i32, i32) {
    %c0_i32 = arith.constant 0 : i32
    %c0_i32_0 = arith.constant 0 : i32
    %c0_i32_1 = arith.constant 0 : i32
    return %c0_i32, %c0_i32_0 : i32, i32
  }
  func.func @transform_2(%arg0: i32) -> (i32, i32) {
    %c0_i32 = arith.constant 0 : i32
    %c0_i32_0 = arith.constant 0 : i32
    %c0_i32_1 = arith.constant 0 : i32
    return %c0_i32, %c0_i32_0 : i32, i32
  }
  func.func @transform_3(%arg0: i32) -> (i32, i32) {
    %c0_i32 = arith.constant 0 : i32
    %c0_i32_0 = arith.constant 0 : i32
    %c0_i32_1 = arith.constant 0 : i32
    return %c0_i32, %c0_i32_0 : i32, i32
  }
  func.func @transform_4(%arg0: i32) -> (i32, i32) {
    %c0_i32 = arith.constant 0 : i32
    %c0_i32_0 = arith.constant 0 : i32
    %c0_i32_1 = arith.constant 0 : i32
    return %c0_i32, %c0_i32_0 : i32, i32
  }
  func.func @transform_5(%arg0: i32) -> (i32, i32) {
    %c0_i32 = arith.constant 0 : i32
    %c0_i32_0 = arith.constant 0 : i32
    return %arg0, %c0_i32 : i32, i32
  }
}

</mosaic_0001>

<bundles_post_ra>
// kernel: tpu_custom_call.1
= control target key start
LH: loop header
LB: loop body
LE: loop exit
PB: predicated region body
PF: predicated region fallthrough
CT: control target
= control target key end

     0   :  { %10 = vsyncpa [#allocation3], 0  ;;  %s627_s0 = inlined_call_operand.hbm [shape: bf16[16,16], index: 0, kind: input, shape index: {}]   ;;  %s628_s1 = inlined_call_operand.hbm [shape: bf16[16,128], index: 1, kind: input, shape index: {}]   ;;  %s629_s2 = inlined_call_operand.vmem [shape: bf16[128,128], index: 2, kind: input, shape index: {}]   ;;  %s630_s3 = inlined_call_operand.vmem [shape: bf16[128,8], index: 3, kind: input, shape index: {}]   ;;  %s631_s4 = inlined_call_operand.vmem [shape: f32[3,128], index: 4, kind: input, shape index: {}]   ;;  %s632_s5 = inlined_call_operand.vmem [shape: f32[16,8], index: 5, kind: output, shape index: {}]  }
   0x1   :  { %11 = vsyncpa [#allocation5], 0  ;;  %s508_s18 = smov [#allocation2]  }
   0x2   :  { %s17_s19 = sshll.u32 %s508_s18, 4  ;;  %s18_s19 = int_to_ptr.vmem [resolvable:$true] %s17_s19 }
   0x3   :  { %s472_s20 = scalar_lea.vmem %s18_s19, 128  ;;  %p477_p1 = scmp.lt.s32.totalorder %s18_s19, %s18_s19 }
   0x4   :  { %p473_p0 = scmp.ne.s32.totalorder %s18_s19, %s472_s20  ;;  %p478_p2 = scmp.lt.s32.totalorder %s472_s20, %s472_s20 }
   0x6   :  { %p479_p3 = por %p478_p2, %p477_p1 }
   0x8   :  { %p480_p4 = pnand %p479_p3, %p473_p0 }
   0xa   :  { %483 = shalt.err (!%p480_p4)
}
   0xb   :  { %s509_s21 = smov 64   ;;  %s510_s22 = smov 4  }
   0xc   :  { %23 = dma.hbm_to_vmem [thread:$0]  %s627_s0, 128, %s18_s19, [#allocation3], %s509_s21, %s509_s21, %s510_s22  }
   0xd   :  { %s511_s25 = smov [#allocation4]  }
   0xe   :  { %s29_s26 = sshll.u32 %s511_s25, 4  ;;  %s30_s26 = int_to_ptr.vmem [resolvable:$true] %s29_s26 }
   0xf   :  { %s492_s27 = scalar_lea.vmem %s30_s26, 128  ;;  %p497_p6 = scmp.lt.s32.totalorder %s30_s26, %s30_s26 }
  0x10   :  { %p493_p5 = scmp.ne.s32.totalorder %s30_s26, %s492_s27  ;;  %p498_p7 = scmp.lt.s32.totalorder %s492_s27, %s492_s27 }
  0x12   :  { %p499_p8 = por %p498_p7, %p497_p6 }
  0x14   :  { %p500_p9 = pnand %p499_p8, %p493_p5 }
  0x16   :  { %503 = shalt.err (!%p500_p9)
}
  0x17   :  { %35 = dma.hbm_to_vmem [thread:$0]  %s628_s1, 128, %s30_s26, [#allocation5], %s509_s21, %s509_s21, %s510_s22  }
  0x18   :  { %504 = dma.done.wait [#allocation3], 128  }
  0x19   :  { %505 = vsyncadd [#allocation3], 4294967168 }
  0x1a   :  { %506 = dma.done.wait [#allocation5], 128  }
  0x1b   :  { %507 = vsyncadd [#allocation5], 4294967168  ;;  %v512_v0 = vmov 0.0   ;;  %vm513_vm0 = vmmov 0   ;;  %v438_v1 = vld [vmem:[#allocation4] sm:$0xff]   ;;  %v439_v2 = vld [vmem:[#allocation2] sm:$0xff]   ;;  %v54_v13 = vlaneseq }
  0x1c   :  { %386 = vmatprep.subr.bf16.mxu0 %v512_v0  ;;  %388 = vmatprep.mubr.msk.bf16.mxu0 %vm513_vm0, %v512_v0  ;;  %vm69_vm1 = vcmask 130048   ;;  %v440_v3 = vld [vmem:[%s629_s2 + $0x38] sm:$0xff]   ;;  %v441_v4 = vld [vmem:[%s629_s2 + $0x30] sm:$0xff]   ;;  %v442_v5 = vld [vmem:[%s629_s2 + $0x28] sm:$0xff]   ;;  %vm338_vm2 = vcmask 64512  }
  0x1d   :  { %392 = vmatprep.subr.bf16.mxu1 %v512_v0  ;;  %408 = vmatprep.mubr.msk.bf16.mxu1 %vm513_vm0, %v512_v0  ;;  %v443_v6 = vld [vmem:[%s629_s2 + $0x20] sm:$0xff]   ;;  %v444_v7 = vld [vmem:[%s629_s2 + $0x18] sm:$0xff]   ;;  %v445_v8 = vld [vmem:[%s629_s2 + $0x10] sm:$0xff]   ;;  %v55_v14 = vshrl.u32 %v54_v13, 7 }
  0x1e   :  { %387 = vmatpush3.bf16.msra.mxu0 %v438_v1  ;;  %393 = vmatpush3.bf16.msra.mxu1 %v440_v3  ;;  %v446_v9 = vld [vmem:[%s629_s2 + $0x8] sm:$0xff]   ;;  %v447_v10 = vld [vmem:[%s629_s2] sm:$0xff]   ;;  %v448_v11 = vld [vmem:[%s630_s3 + $0x38] sm:$0xff]  }
  0x1f   :  { %412 = vmatprep.subr.bf16.mxu0 %v512_v0  ;;  %394 = vmatprep.subr.bf16.mxu1 %v512_v0  ;;  %v449_v12 = vld [vmem:[%s630_s3 + $0x30] sm:$0xff]   ;;  %v56_v15 = vsub.s32 0, %v55_v14  ;;  %v49_v16 = vld [vmem:[%s631_s4] sm:$0x7]  ;;  %v450_v27 = vld [vmem:[%s630_s3 + $0x28] sm:$0xff]   ;;  %v135_v33 = vsub.s32 1, %v55_v14 }
  0x20   :  { %v451_v28 = vld [vmem:[%s630_s3 + $0x20] sm:$0xff]   ;;  %v452_v29 = vld [vmem:[%s630_s3 + $0x18] sm:$0xff]   ;;  %v453_v30 = vld [vmem:[%s630_s3 + $0x10] sm:$0xff]   ;;  %v247_v44 = vsub.s32 2, %v55_v14 }
  0x21   :  { %389 = vmatmul.mubr.msk.bf16.vlgmr.msra.gmra.mxu0 %vm69_vm1, %v439_v2  ;;  %v57_v17 = vrot.slane %v49_v16, %v56_v15  ;;  %v454_v31 = vld [vmem:[%s630_s3 + $0x8] sm:$0xff]   ;;  %v455_v32 = vld [vmem:[%s630_s3] sm:$0xff]   ;;  %v136_v34 = vrot.slane %v49_v16, %v135_v33 }
  0x22   :  { %428 = vmatprep.mubr.msk.bf16.mxu0 %vm513_vm0, %v512_v0  ;;  %395 = vmatpush3.bf16.msra.mxu1 %v441_v4  ;;  %v248_v45 = vrot.slane %v49_v16, %v247_v44 }
  0x23   :  { %396 = vmatprep.subr.bf16.mxu1 %v512_v0  ;;  %413 = vmatpush3.bf16.msra.mxu0 %v448_v11 }
  0x24   :  { %414 = vmatprep.subr.bf16.mxu0 %v512_v0 }
  0x26   :  { %397 = vmatpush3.bf16.msra.mxu1 %v442_v5 }
  0x27   :  { %398 = vmatprep.subr.bf16.mxu1 %v512_v0  ;;  %415 = vmatpush3.bf16.msra.mxu0 %v449_v12 }
  0x28   :  { %416 = vmatprep.subr.bf16.mxu0 %v512_v0 }
  0x2a   :  { %399 = vmatpush3.bf16.msra.mxu1 %v443_v6 }
  0x2b   :  { %400 = vmatprep.subr.bf16.mxu1 %v512_v0  ;;  %417 = vmatpush3.bf16.msra.mxu0 %v450_v27 }
  0x2c   :  { %418 = vmatprep.subr.bf16.mxu0 %v512_v0 }
  0x2e   :  { %401 = vmatpush3.bf16.msra.mxu1 %v444_v7 }
  0x2f   :  { %402 = vmatprep.subr.bf16.mxu1 %v512_v0  ;;  %419 = vmatpush3.bf16.msra.mxu0 %v451_v28 }
  0x30   :  { %420 = vmatprep.subr.bf16.mxu0 %v512_v0 }
  0x32   :  { %403 = vmatpush3.bf16.msra.mxu1 %v445_v8 }
  0x33   :  { %404 = vmatprep.subr.bf16.mxu1 %v512_v0  ;;  %421 = vmatpush3.bf16.msra.mxu0 %v452_v29 }
  0x34   :  { %422 = vmatprep.subr.bf16.mxu0 %v512_v0 }
  0x36   :  { %405 = vmatpush3.bf16.msra.mxu1 %v446_v9 }
  0x37   :  { %406 = vmatprep.subr.bf16.mxu1 %v512_v0  ;;  %423 = vmatpush3.bf16.msra.mxu0 %v453_v30 }
  0x38   :  { %424 = vmatprep.subr.bf16.mxu0 %v512_v0 }
  0x3a   :  { %407 = vmatpush3.bf16.msra.mxu1 %v447_v10 }
  0x3b   :  { %425 = vmatpush3.bf16.msra.mxu0 %v454_v31 }
  0x3c   :  { %426 = vmatprep.subr.bf16.mxu0 %v512_v0 }
  0x3f   :  { %427 = vmatpush3.bf16.msra.mxu0 %v455_v32 }
  0xe1   :  { %v107_v18 = vpop.f32.mrf.mxu0 }
  0xe2   :  { %v108_v19 = vadd.f32 %v107_v18, %v57_v17 }
  0xe3   :  { %v390_v20 = vpop.f32.mrf.mxu0 }
  0xe4   :  { %456 = vtanh.f32 %v108_v19 }
  0xe5   :  { %v110_v21 = vpop.f32.mrf.mxu0 }
  0xe6   :  { %v111_v22 = vadd.f32 %v110_v21, %v57_v17 }
  0xe7   :  { %v391_v23 = vpop.f32.mrf.mxu0 }
  0xe8   :  { %458 = vtanh.f32 %v111_v22 }
  0xf1   :  { %v457_v24 = vpop.eup %456 }
  0xf5   :  { %v459_v25 = vpop.eup %458 }
  0xf6   :  { %v132_v26 = vpack.c.bf16 %v459_v25, %v457_v24 }
  0xf8   :  { %409 = vmatmul.mubr.bf16.vlgmr.msra.gmra.mxu1 %v132_v26 }
 0x1b8   :  { %v219_v35 = vpop.f32.mrf.mxu1 }
 0x1b9   :  { %v220_v36 = vadd.f32 %v219_v35, %v136_v34 }
 0x1ba   :  { %v410_v37 = vpop.f32.mrf.mxu1 }
 0x1bb   :  { %460 = vtanh.f32 %v220_v36 }
 0x1bc   :  { %v222_v38 = vpop.f32.mrf.mxu1 }
 0x1bd   :  { %v223_v39 = vadd.f32 %v222_v38, %v136_v34 }
 0x1be   :  { %v411_v40 = vpop.f32.mrf.mxu1 }
 0x1bf   :  { %462 = vtanh.f32 %v223_v39 }
 0x1c8   :  { %v461_v41 = vpop.eup %460 }
 0x1cc   :  { %v463_v42 = vpop.eup %462 }
 0x1cd   :  { %v244_v43 = vpack.c.bf16 %v463_v42, %v461_v41 }
 0x1cf   :  { %429 = vmatmul.mubr.bf16.vlgmr.msra.gmra.mxu0 %v244_v43 }
 0x28f   :  { %v331_v46 = vpop.f32.mrf.mxu0 }
 0x290   :  { %v332_v47 = vadd.f32 %v331_v46, %v248_v45 }
 0x291   :  { %v430_v48 = vpop.f32.mrf.mxu0 }
 0x292   :  { %339 = vst.msk [vmem:[%s632_s5] sm:$0xff] %vm338_vm2, %v332_v47 }
 0x293   :  { %v334_v49 = vpop.f32.mrf.mxu0 }
 0x294   :  { %v335_v50 = vadd.f32 %v334_v49, %v248_v45 }
 0x295   :  { %v431_v51 = vpop.f32.mrf.mxu0 }
 0x296   :  { %340 = vst.msk [vmem:[%s632_s5 + $0x8] sm:$0xff] %vm338_vm2, %v335_v50 }
 0x297   :  { %345 = vsyncpa [#allocation3], 1 }
 0x298   :  { %346 = vsyncpa [#allocation5], 1 }

</bundles_post_ra>
